<compile_context>
chip_gen: v7x
topology: tpu7x:2x2x1
jax: 0.10.0
libtpu: 0.0.40
codegen_flags: <defaults>
</compile_context>

<pallas_src>
import functools

import jax
import jax.numpy as jnp
from jax.experimental import pallas as pl
from jax.experimental.pallas import tpu as pltpu


LN_EPS = 1e-5  # torch.nn.LayerNorm default


def _patch_embed_kernel(pt_ref, w_ref, prm_ref, o_ref):
    """Pre-centered patch projection + LayerNorm (transposed: patches on lanes).

    pt_ref : (1, K, T)  patches^T tile  (K = C*p*p on sublanes, T patch columns on lanes)
    w_ref  : (E, K)     conv weight with its over-E column mean subtracted (W')
    prm_ref: (E, 3)     packed [b' (mean-centered conv bias), ln_gamma, ln_beta]
    o_ref  : (1, E, T)  output tile (E on sublanes, patch columns on lanes)
    """
    xt = pt_ref[0]  # (K, T)

    # W' @ x + b' is already LayerNorm-centered (zero mean over E) by construction,
    # so no mean matmul and no (E,T)-wide centering pass are needed.
    # (Set precision=jax.lax.Precision.HIGHEST here if bit-closeness to the f32 torch
    #  conv matters; default Mosaic f32 matmul precision passes the 1e-4 tolerance.)
    centered = jnp.dot(w_ref[...], xt, preferred_element_type=jnp.float32)
    centered = centered + prm_ref[:, 0:1]  # b', broadcast along lanes

    # Variance over E (the sublane axis) via a (1/E)-row matmul on the idle MXU,
    # keeping all math in f32 (safe on v5e: no bf16 VPU/EUP).
    e_dim = centered.shape[0]
    mean_row = jnp.full((1, e_dim), 1.0 / e_dim, dtype=jnp.float32)
    var = jnp.dot(mean_row, centered * centered,
                  preferred_element_type=jnp.float32)                 # (1, T)

    y = centered * jax.lax.rsqrt(var + LN_EPS)
    y = y * prm_ref[:, 1:2] + prm_ref[:, 2:3]  # gamma, beta
    o_ref[0] = y.astype(o_ref.dtype)


def _tensorcores_per_chip():
    """Best-effort TensorCore count per JAX device (v7x exposes 2; v5e/v6e expose 1)."""
    try:
        kind = jax.devices()[0].device_kind.lower()
    except Exception:
        return 1
    return 2 if ("v7" in kind or "7x" in kind) else 1


def _pick_tile(total, tile_max, min_steps):
    """Largest multiple-of-128 divisor of `total` (<= tile_max), preferring one that
    leaves >= min_steps grid steps along this axis.  Falls back to the full extent
    (always a legal block)."""
    if total % 128 != 0:
        return total
    limit = min(total, tile_max)
    cands = [d for d in range(128, limit + 1, 128) if total % d == 0]
    if not cands:
        return total
    ok = [d for d in cands if total // d >= min_steps]
    return max(ok) if ok else max(cands)


def patch_embed_forward(x, w_conv, b_conv, gamma, beta, *,
                        patch_size=2, kernel_size=2,
                        out_dtype=jnp.float32, tile_max=None):
    """Pallas-backed PatchEmbed forward (spatial_dims=2).

    x:      (N, C, H, W)            float32, NCHW (like the PyTorch module)
    w_conv: (E, C, k, k)            conv weight (torch OIHW layout)
    b_conv: (E,)                    conv bias
    gamma:  (E,)                    LayerNorm weight
    beta:   (E,)                    LayerNorm bias
    returns (N, E, H_out, W_out)    channels-first, like the PyTorch module
    """
    assert kernel_size == patch_size, "non-overlapping conv == patch matmul"
    p = patch_size
    N, C, H, W = x.shape
    E = w_conv.shape[0]
    K = C * p * p

    # --- padding semantics from the PyTorch 4-D branch (valid because k == p) ---
    h, w = H - kernel_size, W - kernel_size
    pad_w = 0 if (w % p == 0) else (p - w % p)
    pad_h = 0 if (h % p == 0) else (p - h % p)
    if pad_h or pad_w:
        x = jnp.pad(x, ((0, 0), (0, 0), (0, pad_h), (0, pad_w)))
    H2, W2 = H + pad_h, W + pad_w
    Ho, Wo = H2 // p, W2 // p
    HW = Ho * Wo

    cores = _tensorcores_per_chip()
    if tile_max is None:
        tile_max = 16384 if cores > 1 else 8192

    # Lane-dense layout choice: if HW itself is not 128-aligned but N*HW is, flatten the
    # batch onto the lane axis so every store is an unmasked full-lane vst and the grid
    # collapses (test shape: HW=64, N=2 -> one 128-wide step).
    flatten_batch = (HW % 128 != 0) and ((N * HW) % 128 == 0)

    x6 = x.reshape(N, C, Ho, p, Wo, p)
    if flatten_batch:
        # pt[k, n*HW + ho*Wo + wo], k = (c, dh, dw)
        pt = x6.transpose(1, 3, 5, 0, 2, 4).reshape(1, K, N * HW)
        B, T = 1, N * HW
    else:
        # pt[n, k, ho*Wo + wo]
        pt = x6.transpose(0, 1, 3, 5, 2, 4).reshape(N, K, HW)
        B, T = N, HW

    # Pre-centered projection (exact): subtracting the over-E column mean from W and the
    # mean from b makes the kernel's matmul output the LayerNorm-centered activations.
    w_mat = w_conv.reshape(E, K).astype(jnp.float32)
    w_centered = w_mat - jnp.mean(w_mat, axis=0, keepdims=True)        # (E, K)
    b_f32 = b_conv.astype(jnp.float32)
    b_centered = b_f32 - jnp.mean(b_f32)
    params = jnp.stack([b_centered,
                        gamma.astype(jnp.float32),
                        beta.astype(jnp.float32)], axis=1)             # (E, 3)

    # Chip-aware tiling: largest multiple-of-128 tile; only force extra steps on
    # multi-TensorCore chips (>= 2 steps per core across the parallel grid axes).
    min_steps = 1 if cores <= 1 else max(1, (2 * cores + B - 1) // B)
    tile = _pick_tile(T, tile_max, min_steps)
    grid = (B, T // tile)

    out = pl.pallas_call(
        _patch_embed_kernel,
        # NOTE: pass out_dtype=jnp.bfloat16 to halve writeback traffic if the consumer
        # accepts bf16; f32 default matches the PyTorch module exactly.
        out_shape=jax.ShapeDtypeStruct((B, E, T), out_dtype),
        grid_spec=pltpu.PrefetchScalarGridSpec(
            num_scalar_prefetch=0,
            grid=grid,
            in_specs=[
                pl.BlockSpec((1, K, tile), lambda n, j: (n, 0, j)),
                pl.BlockSpec((E, K), lambda n, j: (0, 0)),
                pl.BlockSpec((E, 3), lambda n, j: (0, 0)),
            ],
            out_specs=pl.BlockSpec((1, E, tile), lambda n, j: (n, 0, j)),
        ),
        compiler_params=pltpu.CompilerParams(
            dimension_semantics=("parallel", "parallel"),
            # Let XLA fold the stride-p patch gather (reshape+transpose) into the
            # pallas input DMA instead of materializing `pt` in HBM.
            allow_input_fusion=[True, False, False],
        ),
    )(pt, w_centered, params)

    if flatten_batch:
        # (1, E, N*HW) -> (N, E, Ho, Wo): swaps only the two leading (non-lane) axes;
        # the (Ho, Wo) minor block stays contiguous, so this is a tiny row copy.
        return out.reshape(E, N, Ho, Wo).transpose(1, 0, 2, 3)
    # (N, E, Ho*Wo) -> (N, E, Ho, Wo) is a free row-major reshape (no copy).
    return out.reshape(N, E, Ho, Wo)


def _reference_forward(x, w_conv, b_conv, gamma, beta, *, patch_size=2, kernel_size=2):
    """Plain-JAX reference (conv + layernorm) mirroring the PyTorch module."""
    p = patch_size
    N, C, H, W = x.shape
    h, w = H - kernel_size, W - kernel_size
    pad_w = 0 if (w % p == 0) else (p - w % p)
    pad_h = 0 if (h % p == 0) else (p - h % p)
    if pad_h or pad_w:
        x = jnp.pad(x, ((0, 0), (0, 0), (0, pad_h), (0, pad_w)))
    y = jax.lax.conv_general_dilated(
        x, w_conv, window_strides=(p, p), padding="VALID",
        dimension_numbers=("NCHW", "OIHW", "NCHW"),
    ) + b_conv.reshape(1, -1, 1, 1)
    yt = y.transpose(0, 2, 3, 1)  # (N, Ho, Wo, E)
    mean = jnp.mean(yt, axis=-1, keepdims=True)
    var = jnp.mean((yt - mean) ** 2, axis=-1, keepdims=True)
    yt = (yt - mean) * jax.lax.rsqrt(var + LN_EPS) * gamma + beta
    return yt.transpose(0, 3, 1, 2)


if __name__ == "__main__":
    key = jax.random.PRNGKey(0)
    k_x, k_w, k_b, k_g, k_beta = jax.random.split(key, 5)

    N, C, H, W = 2, 4, 16, 16
    E = 32
    patch = 2
    kernel = 2

    x = jax.random.normal(k_x, (N, C, H, W), dtype=jnp.float32)
    w_conv = jax.random.normal(k_w, (E, C, kernel, kernel), dtype=jnp.float32) * 0.1
    b_conv = jax.random.normal(k_b, (E,), dtype=jnp.float32) * 0.1
    gamma = 1.0 + 0.05 * jax.random.normal(k_g, (E,), dtype=jnp.float32)
    beta = 0.05 * jax.random.normal(k_beta, (E,), dtype=jnp.float32)

    fwd = functools.partial(patch_embed_forward, patch_size=patch, kernel_size=kernel)
    out = jax.jit(fwd)(x, w_conv, b_conv, gamma, beta)
    out = jax.block_until_ready(out)

    ref = _reference_forward(x, w_conv, b_conv, gamma, beta,
                             patch_size=patch, kernel_size=kernel)
    assert out.shape == (N, E, H // patch, W // patch), out.shape
    assert jnp.allclose(out, ref, atol=1e-4, rtol=1e-4), \
        float(jnp.max(jnp.abs(out - ref)))

    print("KERNEL_OK")
</pallas_src>

<mosaic_0001>
module attributes {stable_mosaic.version = 11 : i64} {
  func.func @_patch_embed_kernel(%arg0: i32, %arg1: i32, %arg2: memref<1x16x128xf32, #tpu.memory_space<vmem>>, %arg3: memref<32x16xf32, #tpu.memory_space<vmem>>, %arg4: memref<32x3xf32, #tpu.memory_space<vmem>>, %arg5: memref<1x32x128xf32, #tpu.memory_space<vmem>>) attributes {dimension_semantics = [#tpu.dimension_semantics<parallel>, #tpu.dimension_semantics<parallel>], iteration_bounds = array<i64: 1, 1>, scalar_prefetch = 0 : i64, scratch_operands = 0 : i64, tpu.core_type = #tpu.core_type<tc>, window_params = [{transform_indices = @transform_0, window_bounds = array<i64: 1, 16, 128>}, {pipeline_mode = #tpu.pipeline_mode<synchronous>, transform_indices = @transform_1, window_bounds = array<i64: 32, 16>}, {pipeline_mode = #tpu.pipeline_mode<synchronous>, transform_indices = @transform_2, window_bounds = array<i64: 32, 3>}, {transform_indices = @transform_3, window_bounds = array<i64: 1, 32, 128>}]} {
    %c0 = arith.constant 0 : index
    %c0_0 = arith.constant 0 : index
    %c0_1 = arith.constant 0 : index
    %0 = vector.load %arg2[%c0, %c0_0, %c0_1] : memref<1x16x128xf32, #tpu.memory_space<vmem>>, vector<1x16x128xf32>
    %1 = vector.shape_cast %0 : vector<1x16x128xf32> to vector<16x128xf32>
    %c0_2 = arith.constant 0 : index
    %c0_3 = arith.constant 0 : index
    %2 = vector.load %arg3[%c0_2, %c0_3] : memref<32x16xf32, #tpu.memory_space<vmem>>, vector<32x16xf32>
    %cst = arith.constant dense<0.000000e+00> : vector<32x128xf32>
    %3 = tpu.matmul %2, %1, %cst {dimension_numbers = #tpu.dot_dimension_numbers<[1], [0], [0], [1], [0, 0, 1, 1], [], []>} : vector<32x16xf32>, vector<16x128xf32>, vector<32x128xf32> -> vector<32x128xf32>
    %c0_4 = arith.constant 0 : index
    %c0_5 = arith.constant 0 : index
    %4 = vector.load %arg4[%c0_4, %c0_5] : memref<32x3xf32, #tpu.memory_space<vmem>>, vector<32x1xf32>
    %5 = vector.broadcast %4 : vector<32x1xf32> to vector<32x128xf32>
    %6 = arith.addf %3, %5 : vector<32x128xf32>
    %cst_6 = arith.constant 3.125000e-02 : f32
    %7 = vector.broadcast %cst_6 : f32 to vector<1x32xf32>
    %8 = arith.mulf %6, %6 : vector<32x128xf32>
    %cst_7 = arith.constant dense<0.000000e+00> : vector<1x128xf32>
    %9 = tpu.matmul %7, %8, %cst_7 {dimension_numbers = #tpu.dot_dimension_numbers<[1], [0], [0], [1], [0, 0, 1, 1], [], []>} : vector<1x32xf32>, vector<32x128xf32>, vector<1x128xf32> -> vector<1x128xf32>
    %cst_8 = arith.constant 9.99999974E-6 : f32
    %10 = vector.broadcast %cst_8 : f32 to vector<1x128xf32>
    %11 = arith.addf %9, %10 : vector<1x128xf32>
    %12 = math.rsqrt %11 : vector<1x128xf32>
    %13 = vector.broadcast %12 : vector<1x128xf32> to vector<32x128xf32>
    %14 = arith.mulf %6, %13 : vector<32x128xf32>
    %c0_9 = arith.constant 0 : index
    %c1 = arith.constant 1 : index
    %15 = vector.load %arg4[%c0_9, %c1] : memref<32x3xf32, #tpu.memory_space<vmem>>, vector<32x1xf32>
    %16 = vector.broadcast %15 : vector<32x1xf32> to vector<32x128xf32>
    %17 = arith.mulf %14, %16 : vector<32x128xf32>
    %c0_10 = arith.constant 0 : index
    %c2 = arith.constant 2 : index
    %18 = vector.load %arg4[%c0_10, %c2] : memref<32x3xf32, #tpu.memory_space<vmem>>, vector<32x1xf32>
    %19 = vector.broadcast %18 : vector<32x1xf32> to vector<32x128xf32>
    %20 = arith.addf %17, %19 : vector<32x128xf32>
    %c0_11 = arith.constant 0 : index
    %c0_12 = arith.constant 0 : index
    %c0_13 = arith.constant 0 : index
    %21 = vector.load %arg5[%c0_11, %c0_12, %c0_13] : memref<1x32x128xf32, #tpu.memory_space<vmem>>, vector<1x32x128xf32>
    %22 = vector.shape_cast %21 : vector<1x32x128xf32> to vector<32x128xf32>
    %23 = vector.shape_cast %20 : vector<32x128xf32> to vector<1x32x128xf32>
    tpu.vector_store %arg5[%c0_11, %c0_12, %c0_13], %23 {strides = array<i32>} : memref<1x32x128xf32, #tpu.memory_space<vmem>>, vector<1x32x128xf32>,
    return
  }
  func.func @transform_0(%arg0: i32, %arg1: i32) -> (i32, i32, i32) {
    %c0_i32 = arith.constant 0 : i32
    %c0_i32_0 = arith.constant 0 : i32
    return %arg0, %c0_i32, %arg1 : i32, i32, i32
  }
  func.func @transform_1(%arg0: i32, %arg1: i32) -> (i32, i32) {
    %c0_i32 = arith.constant 0 : i32
    %c0_i32_0 = arith.constant 0 : i32
    %c0_i32_1 = arith.constant 0 : i32
    return %c0_i32, %c0_i32_0 : i32, i32
  }
  func.func @transform_2(%arg0: i32, %arg1: i32) -> (i32, i32) {
    %c0_i32 = arith.constant 0 : i32
    %c0_i32_0 = arith.constant 0 : i32
    %c0_i32_1 = arith.constant 0 : i32
    return %c0_i32, %c0_i32_0 : i32, i32
  }
  func.func @transform_3(%arg0: i32, %arg1: i32) -> (i32, i32, i32) {
    %c0_i32 = arith.constant 0 : i32
    %c0_i32_0 = arith.constant 0 : i32
    return %arg0, %c0_i32, %arg1 : i32, i32, i32
  }
}

</mosaic_0001>

<bundles_post_ra>
// kernel: patch_embed_forward.1
= control target key start
LH: loop header
LB: loop body
LE: loop exit
PB: predicated region body
PF: predicated region fallthrough
CT: control target
= control target key end

     0   :  { %vm44_vm0 = vcmask 130048   ;;  %v339_v3 = vmov 0   ;;  %v340_v12 = vmov 0.0|0.0   ;;  %vm341_vm1 = vmmov 0   ;;  %s412_s0 = inlined_call_operand.vmem [shape: f32[1,16,128], index: 0, kind: input, shape index: {}]   ;;  %s413_s1 = inlined_call_operand.vmem [shape: f32[32,16], index: 1, kind: input, shape index: {}]   ;;  %s414_s2 = inlined_call_operand.vmem [shape: f32[32,3], index: 2, kind: input, shape index: {}]   ;;  %s415_s3 = inlined_call_operand.vmem [shape: f32[1,32,128], index: 3, kind: output, shape index: {}]  }
   0x1   :  { %v14_v0 = vld [vmem:[%s412_s0] sm:$0xff]  ;;  %v15_v1 = vld [vmem:[%s412_s0 + $0x8] sm:$0xff]  ;;  %331 = vset.pattern.permute.xlu0 %v339_v3  ;;  %332 = vset.pattern.permute.xlu1 %v339_v3  ;;  %v22_v6 = vld [vmem:[%s414_s2 + $0x10] sm:$0xff]  ;;  %v342_v13 = vmov 0.0   ;;  %v343_v14 = vmov 1   ;;  %v344_v15 = vmov 2   ;;  %v221_v40 = vlaneseq }
   0x2   :  { %v16_v2 = vld [vmem:[%s413_s1] sm:$0xff]  ;;  %v314_v4 = vpack.c.bf16 %v15_v1, %v14_v0  ;;  %v17_v7 = vld [vmem:[%s413_s1 + $0x8] sm:$0xff]  ;;  %36 = vperm.xlu1 %332, %v22_v6   ;;  %v18_v9 = vld [vmem:[%s413_s1 + $0x10] sm:$0xff]  ;;  %318 = vmatprep.subr.bf16.mxu1 %v340_v12  ;;  %vm146_vm2 = vcmask 261120   ;;  %v345_v34 = vmov 0.03125  }
   0x3   :  { %297 = vmatprep.mubr.msk.f32.mxu0 %vm44_vm0, %v16_v2  ;;  %v20_v5 = vld [vmem:[%s414_s2] sm:$0xff]  ;;  %v21_v8 = vld [vmem:[%s414_s2 + $0x8] sm:$0xff]  ;;  %v23_v10 = vld [vmem:[%s414_s2 + $0x18] sm:$0xff]  ;;  %311 = vmatprep.mubr.msk.f32.mxu1 %vm341_vm1, %v342_v13  ;;  %v222_v41 = vshrl.u32 %v221_v40, 7 }
   0x4   :  { %315 = vmatprep.subr.bf16.mxu0 %v314_v4  ;;  %26 = vperm.xlu0 %331, %v20_v5   ;;  %v19_v11 = vld [vmem:[%s413_s1 + $0x18] sm:$0xff] }
   0x5   :  { %317 = vmatpush3.bf16.msra.mxu0 %v314_v4  ;;  %v223_v44 = vsub.s32 0, %v222_v41 }
   0x6   :  { %41 = vperm.xlu1 %332, %v23_v10  }
   0x8   :  { %298 = vmatmul.mubr.msk.f32.vlgmr.msra.gmra.mrb[0].mxu0 %vm44_vm0, %v17_v7  ;;  %31 = vperm.xlu0 %331, %v21_v8  }
   0x9   :  { %300 = vmatprep.mubr.msk.f32.mxu0 %vm44_vm0, %v18_v9 }
   0xa   :  { %334 = vset.pattern.permute.xlu1 %v343_v14 }
   0xb   :  { %234 = vperm.xlu1 %334, %v21_v8  }
   0xc   :  { %301 = vmatmul.mubr.msk.f32.gmra.mrb[2].mxu0 %vm44_vm0, %v19_v11  ;;  %333 = vset.pattern.permute.xlu0 %v343_v14 }
   0xd   :  { %230 = vperm.xlu0 %333, %v20_v5  }
   0xf   :  { %238 = vperm.xlu1 %334, %v22_v6  }
  0x11   :  { %242 = vperm.xlu0 %333, %v23_v10  }
  0x13   :  { %335 = vset.pattern.permute.xlu1 %v344_v15 }
  0x14   :  { %250 = vperm.xlu1 %335, %v20_v5  }
  0x15   :  { %336 = vset.pattern.permute.xlu0 %v344_v15 }
  0x16   :  { %254 = vperm.xlu0 %336, %v21_v8  }
  0x18   :  { %258 = vperm.xlu1 %335, %v22_v6  }
  0x1c   :  { %262 = vperm.xlu1 %335, %v23_v10  }
  0x81   :  { %v37_v17 = vpop.permute.xlu1 %36 }
  0x83   :  { %v27_v16 = vpop.permute.xlu0 %26 }
  0x85   :  { %v42_v24 = vpop.permute.xlu1 %41 }
  0x87   :  { %v32_v18 = vpop.permute.xlu0 %31 }
  0x8a   :  { %v235_v35 = vpop.permute.xlu1 %234 }
  0x8c   :  { %v231_v43 = vpop.permute.xlu0 %230 }
  0x8e   :  { %v239_v37 = vpop.permute.xlu1 %238 }
  0x90   :  { %v243_v47 = vpop.permute.xlu0 %242 }
  0x93   :  { %v251_v42 = vpop.permute.xlu1 %250 }
  0x95   :  { %v255_v53 = vpop.permute.xlu0 %254 }
  0x97   :  { %v259_v46 = vpop.permute.xlu1 %258 }
  0x9b   :  { %v263_v58 = vpop.permute.xlu1 %262 }
  0xdb   :  { %v299_v19 = vpop.f32.mrb[0].mxu0 }
  0xdc   :  { %v129_v20 = vadd.f32 %v299_v19, %v32_v18  ;;  %v123_v21 = vpop.f32.mrb[1].mxu0 }
  0xdd   :  { %v124_v22 = vadd.f32 %v123_v21, %v27_v16 }
  0xde   :  { %v143_v23 = vmul.f32 %v129_v20, %v129_v20 }
  0xdf   :  { %v142_v25 = vmul.f32 %v124_v22, %v124_v22  ;;  %v302_v26 = vpop.f32.mrb[2].mxu0 }
  0xe0   :  { %v139_v27 = vadd.f32 %v302_v26, %v42_v24  ;;  %v133_v28 = vpop.f32.mrb[3].mxu0 }
  0xe1   :  { %v134_v29 = vadd.f32 %v133_v28, %v37_v17  ;;  %v319_v30 = vpack.c.bf16 %v143_v23, %v142_v25 }
  0xe2   :  { %v145_v31 = vmul.f32 %v139_v27, %v139_v27 }
  0xe3   :  { %v144_v32 = vmul.f32 %v134_v29, %v134_v29  ;;  %320 = vmatpush3.bf16.msra.mxu1 %v319_v30 }
  0xe4   :  { %321 = vmatprep.subr.bf16.mxu1 %v340_v12 }
  0xe5   :  { %v322_v33 = vpack.c.bf16 %v145_v31, %v144_v32 }
  0xe7   :  { %323 = vmatpush3.bf16.msra.mxu1 %v322_v33 }
  0xea   :  { %312 = vmatmul.mubr.msk.f32.vlgmr.msra.gmra.mrb[0].mxu1 %vm146_vm2, %v345_v34 }
 0x1bd   :  { %v216_v36 = vpop.f32.mrb[0].mxu1 }
 0x1be   :  { %v217_v38 = vadd.f32 1e-05, %v216_v36  ;;  %v313_v39 = vpop.f32.mrb[1].mxu1 }
 0x1c0   :  { %337 = vrsqrt.f32 %v217_v38 }
 0x1ca   :  { %v338_v45 = vpop.eup %337 }
 0x1cb   :  { %v224_v48 = vrot.slane %v338_v45, %v223_v44 }
 0x1cd   :  { %v225_v49 = vmul.f32 %v224_v48, %v124_v22  ;;  %v227_v50 = vmul.f32 %v224_v48, %v134_v29  ;;  %v228_v51 = vmul.f32 %v224_v48, %v139_v27  ;;  %v226_v52 = vmul.f32 %v224_v48, %v129_v20 }
 0x1cf   :  { %v245_v54 = vmul.f32 %v231_v43, %v225_v49  ;;  %v247_v55 = vmul.f32 %v239_v37, %v227_v50  ;;  %v248_v56 = vmul.f32 %v243_v47, %v228_v51  ;;  %v246_v57 = vmul.f32 %v235_v35, %v226_v52 }
 0x1d1   :  { %v265_v59 = vadd.f32 %v251_v42, %v245_v54  ;;  %v267_v60 = vadd.f32 %v259_v46, %v247_v55  ;;  %v268_v61 = vadd.f32 %v263_v58, %v248_v56  ;;  %v266_v62 = vadd.f32 %v255_v53, %v246_v57 }
 0x1d3   :  { %269 = vst [vmem:[%s415_s3] sm:$0xff] %v265_v59  ;;  %271 = vst [vmem:[%s415_s3 + $0x10] sm:$0xff] %v267_v60 }
 0x1d4   :  { %272 = vst [vmem:[%s415_s3 + $0x18] sm:$0xff] %v268_v61  ;;  %270 = vst [vmem:[%s415_s3 + $0x8] sm:$0xff] %v266_v62 }

</bundles_post_ra>
